<compile_context>
chip_gen: v5e
topology: v5e:2x2
jax: 0.10.0
libtpu: 0.0.40
codegen_flags: <defaults>
</compile_context>

<pallas_src>
import jax
import jax.numpy as jnp
from jax.experimental import pallas as pl
from jax.experimental.pallas import tpu as pltpu


def _round_up(x, m):
    return ((x + m - 1) // m) * m


def _pad_to(a, shape):
    return jnp.pad(a, [(0, s - d) for d, s in zip(a.shape, shape)])


# ----------------------------------------------------------------------------- kernel
def gru_decoder_kernel(gx_ref, h0_ref, w_ref, b_ref, pred_ref, h_ref):
    """One GRU decode step per grid iteration.

    gx_ref  : [B, 3*HP] f32   precomputed x-side gates (W_i·x + b_ir+b_hr | b_iz+b_hz | b_in)
    h0_ref  : [B, HP]   f32   initial hidden (used only at step 0)
    w_ref   : [HP, 3*HP+OP] bf16   [W_hr | W_hz | W_hn | W_fc] (zero K-padded rows)
    b_ref   : [2, 128]  f32   row 0 = b_hn (padded), row 1 = b_fc (padded)
    pred_ref: [B, OP]   f32   per-step logits (streamed out)
    h_ref   : [B, HP]   f32   hidden-state carry (VMEM-resident, written to HBM once)
    """
    f32, bf16 = jnp.float32, jnp.bfloat16
    HP = h_ref.shape[-1]
    OP = pred_ref.shape[-1]
    W3 = 3 * HP
    t = pl.program_id(0)

    @pl.when(t == 0)
    def _():
        h_ref[...] = h0_ref[...]

    h = h_ref[...]                                     # [B, HP] f32 (padded lanes == 0)
    gx = gx_ref[...]                                   # [B, 3*HP] f32

    # Single fused h-side gate matmul, 128-lane-aligned r|z|n blocks.
    gh = jnp.dot(h.astype(bf16), w_ref[:, :W3], preferred_element_type=f32)

    r = jax.nn.sigmoid(gx[:, 0:HP] + gh[:, 0:HP])
    z = jax.nn.sigmoid(gx[:, HP:2 * HP] + gh[:, HP:2 * HP])
    n = jnp.tanh(gx[:, 2 * HP:W3] + r * (gh[:, 2 * HP:W3] + b_ref[0:1, 0:HP]))
    h_new = (1.0 - z) * n + z * h                      # [B, HP] f32

    h_ref[...] = h_new                                 # carry to next step / final output
    pred_ref[...] = (jnp.dot(h_new.astype(bf16), w_ref[:, W3:W3 + OP],
                             preferred_element_type=f32) + b_ref[1:2, 0:OP])


# ----------------------------------------------------------------------------- params
def init_raw_params(key, output_dim, emb_dim, dec_hid_dim):
    """PyTorch-layout f32 parameters (the 'module')."""
    ks = jax.random.split(key, 7)
    H, E, O = dec_hid_dim, emb_dim, output_dim
    in_dim = E + H
    scale = 0.1
    return dict(
        emb=jax.random.normal(ks[0], (O, E), jnp.float32) * scale,
        w_ih=jax.random.normal(ks[1], (3 * H, in_dim), jnp.float32) * scale,  # [3H, E+H]
        w_hh=jax.random.normal(ks[2], (3 * H, H), jnp.float32) * scale,       # [3H, H]
        b_ih=jax.random.normal(ks[3], (3 * H,), jnp.float32) * scale,
        b_hh=jax.random.normal(ks[4], (3 * H,), jnp.float32) * scale,
        w_fc=jax.random.normal(ks[5], (O, H), jnp.float32) * scale,           # [O, H]
        b_fc=jax.random.normal(ks[6], (O,), jnp.float32) * scale,
    )


def pack_params(raw, dec_hid_dim, emb_dim, output_dim):
    """One-time transpose / lane-pad / bias-fold / bf16 cast."""
    H, E, O = dec_hid_dim, emb_dim, output_dim
    HP, OP = _round_up(H, 128), _round_up(O, 128)
    BP = max(HP, OP)
    in_dim = E + H
    bf16, f32 = jnp.bfloat16, jnp.float32

    w_ih, w_hh, b_ih, b_hh = raw["w_ih"], raw["w_hh"], raw["b_ih"], raw["b_hh"]

    # x-side gate weights [E+H, 3*HP] (used in the whole-sequence XLA precompute).
    wi = jnp.concatenate(
        [_pad_to(w_ih[k * H:(k + 1) * H].T, (in_dim, HP)) for k in range(3)], axis=1)
    # x-side folded bias row [3*HP]: [b_ir+b_hr | b_iz+b_hz | b_in]; padded lanes zero.
    bx = jnp.concatenate([
        _pad_to(b_ih[0:H] + b_hh[0:H], (HP,)),
        _pad_to(b_ih[H:2 * H] + b_hh[H:2 * H], (HP,)),
        _pad_to(b_ih[2 * H:3 * H], (HP,)),
    ])

    # In-kernel weight slab [HP, 3*HP + OP] = [W_hr | W_hz | W_hn | W_fc] (transposed,
    # zero K-padded rows H..HP-1 so padded h lanes can never leak into real lanes).
    wh = jnp.concatenate(
        [_pad_to(w_hh[k * H:(k + 1) * H].T, (HP, HP)) for k in range(3)], axis=1)
    wfc = _pad_to(raw["w_fc"].T, (HP, OP))
    w_slab = jnp.concatenate([wh, wfc], axis=1).astype(bf16)

    # In-kernel bias: row 0 = b_hn (must ride with r * (W_hn h + b_hn)), row 1 = b_fc.
    bias = jnp.stack([_pad_to(b_hh[2 * H:3 * H], (BP,)),
                      _pad_to(raw["b_fc"], (BP,))]).astype(f32)

    return dict(
        emb=raw["emb"].astype(bf16),     # [O, E]        bf16
        wi=wi.astype(bf16),              # [E+H, 3*HP]   bf16
        bx=bx.astype(f32),               # [3*HP]        f32
        w_slab=w_slab,                   # [HP, 3*HP+OP] bf16
        bias=bias,                       # [2, BP]       f32
    )


# ----------------------------------------------------------------------------- wrapper
def make_decoder(packed, dec_hid_dim, emb_dim, output_dim):
    H, E, O = dec_hid_dim, emb_dim, output_dim
    HP, OP = _round_up(H, 128), _round_up(O, 128)
    BP = max(HP, OP)
    W3 = 3 * HP
    bf16, f32 = jnp.bfloat16, jnp.float32

    @jax.jit
    def decode(targets, hidden, enc_hidden):
        """Teacher-forced multi-step decode in ONE pallas_call.
        targets: [T, B] int32, hidden: [1, B, H] f32, enc_hidden: [1, B, H] f32.
        Returns (preds [T, B, O], h_T [1, B, H]).  T=1 == Decoder.forward."""
        T, B = targets.shape

        # Whole-sequence precompute (one gather + one batched matmul for all T steps,
        # no per-step XLA dispatch): gx[t] = W_i @ [emb_t | enc_h] + folded biases.
        emb_all = packed["emb"][targets]                                       # [T,B,E] bf16
        enc_b = jnp.broadcast_to(enc_hidden[0].astype(bf16)[None], (T, B, H))  # [T,B,H] bf16
        x_all = jnp.concatenate([emb_all, enc_b], axis=-1)                     # [T,B,E+H]
        gx_all = (jnp.einsum("tbk,kn->tbn", x_all, packed["wi"],
                             preferred_element_type=f32) + packed["bx"])       # [T,B,3HP] f32
        h0 = jnp.pad(hidden[0], ((0, 0), (0, HP - H)))                         # [B,HP] f32

        preds_p, h_p = pl.pallas_call(
            gru_decoder_kernel,
            grid=(T,),
            in_specs=[
                pl.BlockSpec((None, B, W3), lambda t: (t, 0, 0)),   # gx: streamed per step
                pl.BlockSpec((B, HP), lambda t: (0, 0)),            # h0: fetched once
                pl.BlockSpec((HP, W3 + OP), lambda t: (0, 0)),      # weight slab: resident
                pl.BlockSpec((2, BP), lambda t: (0, 0)),            # [b_hn ; b_fc]: resident
            ],
            out_specs=(
                pl.BlockSpec((None, B, OP), lambda t: (t, 0, 0)),   # per-step logits
                pl.BlockSpec((B, HP), lambda t: (0, 0)),            # hidden carry -> final h
            ),
            out_shape=(jax.ShapeDtypeStruct((T, B, OP), f32),
                       jax.ShapeDtypeStruct((B, HP), f32)),
            compiler_params=pltpu.CompilerParams(
                dimension_semantics=("arbitrary",)),                # sequential: state carry
        )(gx_all, h0, packed["w_slab"], packed["bias"])

        return preds_p[:, :, :O], h_p[:, :H][None]

    def fwd(target, hidden, enc_hidden):
        """Single-step Decoder.forward: ([B], [1,B,H], [1,B,H]) -> ([B,O], [1,B,H])."""
        preds, h_new = decode(target[None, :], hidden, enc_hidden)
        return preds[0], h_new

    return fwd, decode


# ----------------------------------------------------------------------------- reference
def decoder_forward_ref(raw, target, hidden, enc_hidden):
    """Pure-JAX reference with PyTorch GRU semantics, mirroring the kernel's precision
    choices (bf16 matmul operands, f32 accumulation / gate math)."""
    bf16, f32 = jnp.bfloat16, jnp.float32
    H = raw["w_hh"].shape[1]
    emb = raw["emb"].astype(bf16)[target]
    x = jnp.concatenate([emb, enc_hidden[0].astype(bf16)], axis=-1)
    h = hidden[0]
    gi = jnp.dot(x, raw["w_ih"].astype(bf16).T, preferred_element_type=f32) + raw["b_ih"]
    gh = jnp.dot(h.astype(bf16), raw["w_hh"].astype(bf16).T,
                 preferred_element_type=f32) + raw["b_hh"]
    r = jax.nn.sigmoid(gi[:, :H] + gh[:, :H])
    z = jax.nn.sigmoid(gi[:, H:2 * H] + gh[:, H:2 * H])
    n = jnp.tanh(gi[:, 2 * H:] + r * gh[:, 2 * H:])
    h_new = (1.0 - z) * n + z * h
    pred = jnp.dot(h_new.astype(bf16), raw["w_fc"].astype(bf16).T,
                   preferred_element_type=f32) + raw["b_fc"]
    return pred, h_new[None]


# ----------------------------------------------------------------------------- main
if __name__ == "__main__":
    # small shapes: vocab (output_dim)=64, emb_dim=16, dec_hid_dim=32, batch=8, steps=6
    OUTPUT_DIM, EMB_DIM, DEC_HID_DIM, B, T = 64, 16, 32, 8, 6

    key = jax.random.PRNGKey(0)
    k_param, k_tgt, k_hid, k_enc, k_seq = jax.random.split(key, 5)

    raw = init_raw_params(k_param, OUTPUT_DIM, EMB_DIM, DEC_HID_DIM)
    packed = pack_params(raw, DEC_HID_DIM, EMB_DIM, OUTPUT_DIM)
    decoder_forward, decoder_decode = make_decoder(packed, DEC_HID_DIM, EMB_DIM, OUTPUT_DIM)

    target = jax.random.randint(k_tgt, (B,), 0, OUTPUT_DIM, dtype=jnp.int32)
    hidden = jax.random.normal(k_hid, (1, B, DEC_HID_DIM), jnp.float32)
    enc_hidden = jax.random.normal(k_enc, (1, B, DEC_HID_DIM), jnp.float32)

    # ---- single-step forward (exact Decoder.forward semantics, T=1) ----
    pred, h_new = decoder_forward(target, hidden, enc_hidden)
    jax.block_until_ready((pred, h_new))
    pred_ref, h_ref = decoder_forward_ref(raw, target, hidden, enc_hidden)
    assert pred.shape == (B, OUTPUT_DIM) and h_new.shape == (1, B, DEC_HID_DIM)
    assert jnp.allclose(pred, pred_ref, atol=2e-3, rtol=2e-3)
    assert jnp.allclose(h_new, h_ref, atol=2e-3, rtol=2e-3)

    # ---- hoisted multi-step (teacher-forced) decode: one pallas_call for T steps ----
    targets = jax.random.randint(k_seq, (T, B), 0, OUTPUT_DIM, dtype=jnp.int32)
    preds, h_T = decoder_decode(targets, hidden, enc_hidden)
    jax.block_until_ready((preds, h_T))
    h_r = hidden
    for t in range(T):
        p_r, h_r = decoder_forward_ref(raw, targets[t], h_r, enc_hidden)
        assert jnp.allclose(preds[t], p_r, atol=2e-3, rtol=2e-3)
    assert jnp.allclose(h_T, h_r, atol=2e-3, rtol=2e-3)

    print("KERNEL_OK")
</pallas_src>

<mosaic_0001>
module attributes {stable_mosaic.version = 11 : i64} {
  func.func @gru_decoder_kernel(%arg0: i32, %arg1: memref<1x8x384xf32, #tpu.memory_space<vmem>>, %arg2: memref<8x128xf32, #tpu.memory_space<vmem>>, %arg3: memref<128x512xbf16, #tpu.memory_space<vmem>>, %arg4: memref<2x128xf32, #tpu.memory_space<vmem>>, %arg5: memref<1x8x128xf32, #tpu.memory_space<vmem>>, %arg6: memref<8x128xf32, #tpu.memory_space<vmem>>) attributes {dimension_semantics = [#tpu.dimension_semantics<arbitrary>], iteration_bounds = array<i64: 1>, scalar_prefetch = 0 : i64, scratch_operands = 0 : i64, tpu.core_type = #tpu.core_type<tc>, window_params = [{transform_indices = @transform_0, window_bounds = array<i64: 1, 8, 384>}, {pipeline_mode = #tpu.pipeline_mode<synchronous>, transform_indices = @transform_1, window_bounds = array<i64: 8, 128>}, {pipeline_mode = #tpu.pipeline_mode<synchronous>, transform_indices = @transform_2, window_bounds = array<i64: 128, 512>}, {pipeline_mode = #tpu.pipeline_mode<synchronous>, transform_indices = @transform_3, window_bounds = array<i64: 2, 128>}, {transform_indices = @transform_4, window_bounds = array<i64: 1, 8, 128>}, {pipeline_mode = #tpu.pipeline_mode<synchronous>, transform_indices = @transform_5, window_bounds = array<i64: 8, 128>}]} {
    %c0_i32 = arith.constant 0 : i32
    %0 = arith.cmpi eq, %arg0, %c0_i32 : i32
    %1 = arith.extui %0 : i1 to i32
    %c0_i32_0 = arith.constant 0 : i32
    %2 = arith.cmpi ne, %1, %c0_i32_0 : i32
    scf.if %2 {
      %c0_20 = arith.constant 0 : index
      %c0_21 = arith.constant 0 : index
      %48 = vector.load %arg2[%c0_20, %c0_21] : memref<8x128xf32, #tpu.memory_space<vmem>>, vector<8x128xf32>
      %c0_22 = arith.constant 0 : index
      %c0_23 = arith.constant 0 : index
      %49 = vector.load %arg6[%c0_22, %c0_23] : memref<8x128xf32, #tpu.memory_space<vmem>>, vector<8x128xf32>
      tpu.vector_store %arg6[%c0_22, %c0_23], %48 {strides = array<i32>} : memref<8x128xf32, #tpu.memory_space<vmem>>, vector<8x128xf32>,
    } else {
    }
    %c0 = arith.constant 0 : index
    %c0_1 = arith.constant 0 : index
    %3 = vector.load %arg6[%c0, %c0_1] : memref<8x128xf32, #tpu.memory_space<vmem>>, vector<8x128xf32>
    %c0_2 = arith.constant 0 : index
    %c0_3 = arith.constant 0 : index
    %c0_4 = arith.constant 0 : index
    %4 = vector.load %arg1[%c0_2, %c0_3, %c0_4] : memref<1x8x384xf32, #tpu.memory_space<vmem>>, vector<1x8x384xf32>
    %5 = vector.shape_cast %4 : vector<1x8x384xf32> to vector<8x384xf32>
    %6 = arith.truncf %3 : vector<8x128xf32> to vector<8x128xbf16>
    %c0_5 = arith.constant 0 : index
    %c0_6 = arith.constant 0 : index
    %7 = vector.load %arg3[%c0_5, %c0_6] : memref<128x512xbf16, #tpu.memory_space<vmem>>, vector<128x384xbf16>
    %cst = arith.constant dense<0.000000e+00> : vector<8x384xf32>
    %8 = tpu.matmul %6, %7, %cst {dimension_numbers = #tpu.dot_dimension_numbers<[1], [0], [0], [1], [0, 0, 1, 1], [], []>} : vector<8x128xbf16>, vector<128x384xbf16>, vector<8x384xf32> -> vector<8x384xf32>
    %9 = vector.extract_strided_slice %5 {offsets = [0, 0], sizes = [8, 128], strides = [1, 1]} : vector<8x384xf32> to vector<8x128xf32>
    %10 = vector.extract_strided_slice %8 {offsets = [0, 0], sizes = [8, 128], strides = [1, 1]} : vector<8x384xf32> to vector<8x128xf32>
    %11 = arith.addf %9, %10 : vector<8x128xf32>
    %12 = arith.negf %11 : vector<8x128xf32>
    %13 = math.exp %12 : vector<8x128xf32>
    %cst_7 = arith.constant 1.000000e+00 : f32
    %14 = vector.broadcast %cst_7 : f32 to vector<8x128xf32>
    %15 = arith.addf %14, %13 : vector<8x128xf32>
    %16 = arith.divf %14, %15 : vector<8x128xf32>
    %17 = vector.extract_strided_slice %5 {offsets = [0, 128], sizes = [8, 128], strides = [1, 1]} : vector<8x384xf32> to vector<8x128xf32>
    %18 = vector.extract_strided_slice %8 {offsets = [0, 128], sizes = [8, 128], strides = [1, 1]} : vector<8x384xf32> to vector<8x128xf32>
    %19 = arith.addf %17, %18 : vector<8x128xf32>
    %20 = arith.negf %19 : vector<8x128xf32>
    %21 = math.exp %20 : vector<8x128xf32>
    %cst_8 = arith.constant 1.000000e+00 : f32
    %22 = vector.broadcast %cst_8 : f32 to vector<8x128xf32>
    %23 = arith.addf %22, %21 : vector<8x128xf32>
    %24 = arith.divf %22, %23 : vector<8x128xf32>
    %25 = vector.extract_strided_slice %5 {offsets = [0, 256], sizes = [8, 128], strides = [1, 1]} : vector<8x384xf32> to vector<8x128xf32>
    %26 = vector.extract_strided_slice %8 {offsets = [0, 256], sizes = [8, 128], strides = [1, 1]} : vector<8x384xf32> to vector<8x128xf32>
    %c0_9 = arith.constant 0 : index
    %c0_10 = arith.constant 0 : index
    %27 = vector.load %arg4[%c0_9, %c0_10] : memref<2x128xf32, #tpu.memory_space<vmem>>, vector<1x128xf32>
    %28 = vector.broadcast %27 : vector<1x128xf32> to vector<8x128xf32>
    %29 = arith.addf %26, %28 : vector<8x128xf32>
    %30 = arith.mulf %16, %29 : vector<8x128xf32>
    %31 = arith.addf %25, %30 : vector<8x128xf32>
    %32 = math.tanh %31 : vector<8x128xf32>
    %cst_11 = arith.constant 1.000000e+00 : f32
    %33 = vector.broadcast %cst_11 : f32 to vector<8x128xf32>
    %34 = arith.subf %33, %24 : vector<8x128xf32>
    %35 = arith.mulf %34, %32 : vector<8x128xf32>
    %36 = arith.mulf %24, %3 : vector<8x128xf32>
    %37 = arith.addf %35, %36 : vector<8x128xf32>
    %c0_12 = arith.constant 0 : index
    %c0_13 = arith.constant 0 : index
    %38 = vector.load %arg6[%c0_12, %c0_13] : memref<8x128xf32, #tpu.memory_space<vmem>>, vector<8x128xf32>
    tpu.vector_store %arg6[%c0_12, %c0_13], %37 {strides = array<i32>} : memref<8x128xf32, #tpu.memory_space<vmem>>, vector<8x128xf32>,
    %39 = arith.truncf %37 : vector<8x128xf32> to vector<8x128xbf16>
    %c0_14 = arith.constant 0 : index
    %c384 = arith.constant 384 : index
    %40 = vector.load %arg3[%c0_14, %c384] : memref<128x512xbf16, #tpu.memory_space<vmem>>, vector<128x128xbf16>
    %cst_15 = arith.constant dense<0.000000e+00> : vector<8x128xf32>
    %41 = tpu.matmul %39, %40, %cst_15 {dimension_numbers = #tpu.dot_dimension_numbers<[1], [0], [0], [1], [0, 0, 1, 1], [], []>} : vector<8x128xbf16>, vector<128x128xbf16>, vector<8x128xf32> -> vector<8x128xf32>
    %c1 = arith.constant 1 : index
    %c0_16 = arith.constant 0 : index
    %42 = vector.load %arg4[%c1, %c0_16] : memref<2x128xf32, #tpu.memory_space<vmem>>, vector<1x128xf32>
    %43 = vector.broadcast %42 : vector<1x128xf32> to vector<8x128xf32>
    %44 = arith.addf %41, %43 : vector<8x128xf32>
    %c0_17 = arith.constant 0 : index
    %c0_18 = arith.constant 0 : index
    %c0_19 = arith.constant 0 : index
    %45 = vector.load %arg5[%c0_17, %c0_18, %c0_19] : memref<1x8x128xf32, #tpu.memory_space<vmem>>, vector<1x8x128xf32>
    %46 = vector.shape_cast %45 : vector<1x8x128xf32> to vector<8x128xf32>
    %47 = vector.shape_cast %44 : vector<8x128xf32> to vector<1x8x128xf32>
    tpu.vector_store %arg5[%c0_17, %c0_18, %c0_19], %47 {strides = array<i32>} : memref<1x8x128xf32, #tpu.memory_space<vmem>>, vector<1x8x128xf32>,
    return
  }
  func.func @transform_0(%arg0: i32) -> (i32, i32, i32) {
    %c0_i32 = arith.constant 0 : i32
    %c0_i32_0 = arith.constant 0 : i32
    %c0_i32_1 = arith.constant 0 : i32
    return %arg0, %c0_i32, %c0_i32_0 : i32, i32, i32
  }
  func.func @transform_1(%arg0: i32) -> (i32, i32) {
    %c0_i32 = arith.constant 0 : i32
    %c0_i32_0 = arith.constant 0 : i32
    %c0_i32_1 = arith.constant 0 : i32
    return %c0_i32, %c0_i32_0 : i32, i32
  }
  func.func @transform_2(%arg0: i32) -> (i32, i32) {
    %c0_i32 = arith.constant 0 : i32
    %c0_i32_0 = arith.constant 0 : i32
    %c0_i32_1 = arith.constant 0 : i32
    return %c0_i32, %c0_i32_0 : i32, i32
  }
  func.func @transform_3(%arg0: i32) -> (i32, i32) {
    %c0_i32 = arith.constant 0 : i32
    %c0_i32_0 = arith.constant 0 : i32
    %c0_i32_1 = arith.constant 0 : i32
    return %c0_i32, %c0_i32_0 : i32, i32
  }
  func.func @transform_4(%arg0: i32) -> (i32, i32, i32) {
    %c0_i32 = arith.constant 0 : i32
    %c0_i32_0 = arith.constant 0 : i32
    %c0_i32_1 = arith.constant 0 : i32
    return %arg0, %c0_i32, %c0_i32_0 : i32, i32, i32
  }
  func.func @transform_5(%arg0: i32) -> (i32, i32) {
    %c0_i32 = arith.constant 0 : i32
    %c0_i32_0 = arith.constant 0 : i32
    %c0_i32_1 = arith.constant 0 : i32
    return %c0_i32, %c0_i32_0 : i32, i32
  }
}

</mosaic_0001>

<bundles_post_ra>
// kernel: decode.1
= control target key start
LH: loop header
LB: loop body
LE: loop exit
PB: predicated region body
PF: predicated region fallthrough
CT: control target
= control target key end

     0   :  { %11 = vsyncpa [#allocation3], 0  ;;  %s695_s0 = inlined_call_operand.vmem [shape: f32[1,8,384], index: 0, kind: input, shape index: {}]   ;;  %s696_s1 = inlined_call_operand.vmem [shape: f32[8,128], index: 1, kind: input, shape index: {}]   ;;  %s697_s2 = inlined_call_operand.hbm [shape: bf16[128,512], index: 2, kind: input, shape index: {}]   ;;  %s698_s3 = inlined_call_operand.vmem [shape: f32[2,128], index: 3, kind: input, shape index: {}]   ;;  %s699_s4 = inlined_call_operand.hbm [shape: f32[1,8,128], index: 4, kind: output, shape index: {0}]   ;;  %s700_s5 = inlined_call_operand.vmem [shape: f32[8,128], index: 5, kind: output, shape index: {1}]  }
   0x1   :  { %12 = vsyncpa [#allocation4], 0  ;;  %s21_s20 = sshll.u32 %s697_s2, 4  ;;  %s629_s21 = smov [#allocation2]   ;;  %s22_s20 = int_to_ptr.hbm [resolvable:$true] %s21_s20 }
   0x2   :  { %s23_s22 = sshll.u32 %s629_s21, 4  ;;  %s630_s23 = smov 256   ;;  %s24_s22 = int_to_ptr.vmem [resolvable:$true] %s23_s22 }
   0x3   :  { %s631_s24 = smov 16  }
   0x4   :  { %29 = dma.hbm_to_vmem [thread:$0]  %s22_s20, 4096, %s24_s22, [#allocation3], %s630_s23, %s630_s23, %s631_s24  }
   0x5   :  { %625 = dma.done.wait [#allocation3], 4096  }
   0x6   :  { %626 = vsyncadd [#allocation3], 4294963200  ;;  %v485_v0 = vld [vmem:[#allocation2 + $0xe0] sm:$0xf]  ;;  %v551_v1 = vld [vmem:[#allocation2 + $0xec] sm:$0xf0] }
   0x7   :  { %v550_v2 = vld [vmem:[#allocation2 + $0xe4] sm:$0xf]  ;;  %v486_v3 = vor.u32 %v551_v1, %v485_v0  ;;  %v487_v4 = vld [vmem:[#allocation2 + $0xf0] sm:$0xf0]  ;;  %v473_v5 = vld [vmem:[#allocation2 + $0xc0] sm:$0xf] }
   0x8   :  { %v548_v6 = vld [vmem:[#allocation2 + $0xcc] sm:$0xf0]  ;;  %v490_v7 = vor.u32 %v550_v2, %v487_v4  ;;  %v547_v8 = vld [vmem:[#allocation2 + $0xc4] sm:$0xf]  ;;  %v475_v9 = vld [vmem:[#allocation2 + $0xd0] sm:$0xf0] }
   0x9   :  { %207 = vmatpush.bf16.msra.mxu0 %v486_v3  ;;  %v474_v10 = vor.u32 %v548_v6, %v473_v5  ;;  %v478_v11 = vor.u32 %v547_v8, %v475_v9  ;;  %v461_v12 = vld [vmem:[#allocation2 + $0xa0] sm:$0xf]  ;;  %v545_v13 = vld [vmem:[#allocation2 + $0xac] sm:$0xf0]  ;;  %v544_v14 = vld [vmem:[#allocation2 + $0xa4] sm:$0xf] }
   0xa   :  { %220 = vmatpush.bf16.msra.mxu1 %v490_v7  ;;  %v463_v15 = vld [vmem:[#allocation2 + $0xb0] sm:$0xf0]  ;;  %v493_v16 = vld [vmem:[#allocation2 + $0xe8] sm:$0xf]  ;;  %v552_v17 = vld [vmem:[#allocation2 + $0xf4] sm:$0xf0]  ;;  %v462_v19 = vor.u32 %v545_v13, %v461_v12 }
   0xb   :  { %v494_v18 = vor.u32 %v552_v17, %v493_v16  ;;  %v481_v20 = vld [vmem:[#allocation2 + $0xc8] sm:$0xf]  ;;  %v549_v21 = vld [vmem:[#allocation2 + $0xd4] sm:$0xf0]  ;;  %v466_v22 = vor.u32 %v544_v14, %v463_v15  ;;  %v449_v23 = vld [vmem:[#allocation2 + $0x80] sm:$0xf] }
   0xc   :  { %v542_v24 = vld [vmem:[#allocation2 + $0x8c] sm:$0xf0]  ;;  %v541_v25 = vld [vmem:[#allocation2 + $0x84] sm:$0xf]  ;;  %v482_v26 = vor.u32 %v549_v21, %v481_v20  ;;  %v451_v27 = vld [vmem:[#allocation2 + $0x90] sm:$0xf0] }
   0xd   :  { %208 = vmatpush.bf16.msra.mxu0 %v474_v10  ;;  %233 = vmatpush.bf16.msra.mxu2 %v494_v18  ;;  %v469_v28 = vld [vmem:[#allocation2 + $0xa8] sm:$0xf]  ;;  %v546_v29 = vld [vmem:[#allocation2 + $0xb4] sm:$0xf0]  ;;  %v450_v30 = vor.u32 %v542_v24, %v449_v23  ;;  %v454_v31 = vor.u32 %v541_v25, %v451_v27  ;;  %v437_v32 = vld [vmem:[#allocation2 + $0x60] sm:$0xf] }
   0xe   :  { %221 = vmatpush.bf16.msra.mxu1 %v478_v11  ;;  %v539_v33 = vld [vmem:[#allocation2 + $0x6c] sm:$0xf0]  ;;  %v538_v34 = vld [vmem:[#allocation2 + $0x64] sm:$0xf]  ;;  %v470_v35 = vor.u32 %v546_v29, %v469_v28  ;;  %v439_v36 = vld [vmem:[#allocation2 + $0x70] sm:$0xf0] }
   0xf   :  { %v457_v37 = vld [vmem:[#allocation2 + $0x88] sm:$0xf]  ;;  %v543_v38 = vld [vmem:[#allocation2 + $0x94] sm:$0xf0]  ;;  %v438_v39 = vor.u32 %v539_v33, %v437_v32  ;;  %v425_v40 = vld [vmem:[#allocation2 + $0x40] sm:$0xf]  ;;  %v442_v42 = vor.u32 %v538_v34, %v439_v36 }
  0x10   :  { %v536_v41 = vld [vmem:[#allocation2 + $0x4c] sm:$0xf0]  ;;  %v535_v43 = vld [vmem:[#allocation2 + $0x44] sm:$0xf]  ;;  %v427_v44 = vld [vmem:[#allocation2 + $0x50] sm:$0xf0]  ;;  %v458_v45 = vor.u32 %v543_v38, %v457_v37 }
  0x11   :  { %209 = vmatpush.bf16.msra.mxu0 %v462_v19  ;;  %234 = vmatpush.bf16.msra.mxu2 %v482_v26  ;;  %v445_v46 = vld [vmem:[#allocation2 + $0x68] sm:$0xf]  ;;  %v540_v47 = vld [vmem:[#allocation2 + $0x74] sm:$0xf0]  ;;  %v426_v48 = vor.u32 %v536_v41, %v425_v40  ;;  %v430_v49 = vor.u32 %v535_v43, %v427_v44  ;;  %v413_v50 = vld [vmem:[#allocation2 + $0x20] sm:$0xf] }
  0x12   :  { %222 = vmatpush.bf16.msra.mxu1 %v466_v22  ;;  %v533_v51 = vld [vmem:[#allocation2 + $0x2c] sm:$0xf0]  ;;  %v532_v52 = vld [vmem:[#allocation2 + $0x24] sm:$0xf]  ;;  %v446_v53 = vor.u32 %v540_v47, %v445_v46  ;;  %v415_v54 = vld [vmem:[#allocation2 + $0x30] sm:$0xf0] }
  0x13   :  { %v433_v55 = vld [vmem:[#allocation2 + $0x48] sm:$0xf]  ;;  %v537_v56 = vld [vmem:[#allocation2 + $0x54] sm:$0xf0]  ;;  %v414_v57 = vor.u32 %v533_v51, %v413_v50  ;;  %v418_v58 = vor.u32 %v532_v52, %v415_v54  ;;  %v401_v59 = vld [vmem:[#allocation2] sm:$0xf] }
  0x14   :  { %v530_v60 = vld [vmem:[#allocation2 + $0xc] sm:$0xf0]  ;;  %v529_v61 = vld [vmem:[#allocation2 + $0x4] sm:$0xf]  ;;  %v434_v62 = vor.u32 %v537_v56, %v433_v55  ;;  %v403_v63 = vld [vmem:[#allocation2 + $0x10] sm:$0xf0] }
  0x15   :  { %210 = vmatpush.bf16.msra.mxu0 %v450_v30  ;;  %235 = vmatpush.bf16.msra.mxu2 %v470_v35  ;;  %v421_v0 = vld [vmem:[#allocation2 + $0x28] sm:$0xf]  ;;  %v534_v1 = vld [vmem:[#allocation2 + $0x34] sm:$0xf0]  ;;  %v402_v2 = vor.u32 %v530_v60, %v401_v59  ;;  %v669_v3 = vld [vmem:[%s696_s1] sm:$0xff]  ;;  %v406_v4 = vor.u32 %v529_v61, %v403_v63  ;;  %s632_s11 = smov [#allocation5]  }
  0x16   :  { %223 = vmatpush.bf16.msra.mxu1 %v454_v31  ;;  %v422_v5 = vor.u32 %v534_v1, %v421_v0  ;;  %v409_v6 = vld [vmem:[#allocation2 + $0x8] sm:$0xf]  ;;  %v531_v7 = vld [vmem:[#allocation2 + $0x14] sm:$0xf0]  ;;  %v46_v8 = vpack.c.bf16 %v669_v3, %v669_v3  ;;  %v527_v10 = vld [vmem:[#allocation2 + $0xec] sm:$0xf] }
  0x17   :  { %v410_v9 = vor.u32 %v531_v7, %v409_v6  ;;  %v560_v11 = vld [vmem:[#allocation2 + $0xf8] sm:$0xf0]  ;;  %v523_v13 = vld [vmem:[#allocation2 + $0xcc] sm:$0xf]  ;;  %v43_v22 = vld [vmem:[%s695_s0] sm:$0xff]  ;;  %s383_s12 = sshll.u32 %s632_s11, 4  ;;  %s384_s12 = int_to_ptr.vmem [resolvable:$true] %s383_s12 }
  0x18   :  { %v528_v12 = vor.u32 %v560_v11, %v527_v10  ;;  %v559_v14 = vld [vmem:[#allocation2 + $0xd8] sm:$0xf0]  ;;  %v519_v16 = vld [vmem:[#allocation2 + $0xac] sm:$0xf]  ;;  %v565_v55 = vld [vmem:[%s698_s3] ss:$0 sm:$0xff] }
  0x19   :  { %211 = vmatpush.bf16.msra.mxu0 %v438_v39  ;;  %236 = vmatpush.bf16.msra.mxu2 %v458_v45  ;;  %v524_v15 = vor.u32 %v559_v14, %v523_v13  ;;  %v558_v17 = vld [vmem:[#allocation2 + $0xb8] sm:$0xf0]  ;;  %v515_v19 = vld [vmem:[#allocation2 + $0x8c] sm:$0xf]  ;;  %v45_v1 = vld [vmem:[%s695_s0 + $0x10] sm:$0xff]  ;;  %s385_s15 = sshll.u32 %s699_s4, 4  ;;  %s386_s15 = int_to_ptr.hbm [resolvable:$true] %s385_s15 }
  0x1a   :  { %224 = vmatpush.bf16.msra.mxu1 %v442_v42  ;;  %364 = vmatpush.bf16.msra.mxu3 %v528_v12  ;;  %v520_v18 = vor.u32 %v558_v17, %v519_v16  ;;  %v557_v20 = vld [vmem:[#allocation2 + $0x98] sm:$0xf0]  ;;  %v44_v23 = vld [vmem:[%s695_s0 + $0x8] sm:$0xff] }
  0x1b   :  { %v516_v21 = vor.u32 %v557_v20, %v515_v19  ;;  %v511_v24 = vld [vmem:[#allocation2 + $0x6c] sm:$0xf]  ;;  %v556_v25 = vld [vmem:[#allocation2 + $0x78] sm:$0xf0] }
  0x1c   :  { %v512_v27 = vor.u32 %v556_v25, %v511_v24  ;;  %v507_v32 = vld [vmem:[#allocation2 + $0x4c] sm:$0xf]  ;;  %v555_v33 = vld [vmem:[#allocation2 + $0x58] sm:$0xf0] }
  0x1d   :  { %212 = vmatpush.bf16.msra.mxu0 %v426_v48  ;;  %237 = vmatpush.bf16.msra.mxu2 %v446_v53  ;;  %v508_v35 = vor.u32 %v555_v33, %v507_v32  ;;  %v503_v36 = vld [vmem:[#allocation2 + $0x2c] sm:$0xf]  ;;  %v554_v37 = vld [vmem:[#allocation2 + $0x38] sm:$0xf0] }
  0x1e   :  { %225 = vmatpush.bf16.msra.mxu1 %v430_v49  ;;  %365 = vmatpush.bf16.msra.mxu3 %v524_v15  ;;  %v504_v38 = vor.u32 %v554_v37, %v503_v36  ;;  %v499_v39 = vld [vmem:[#allocation2 + $0xc] sm:$0xf]  ;;  %v553_v40 = vld [vmem:[#allocation2 + $0x18] sm:$0xf0] }
  0x1f   :  { %v500_v43 = vor.u32 %v553_v40, %v499_v39 }
  0x21   :  { %213 = vmatpush.bf16.msra.mxu0 %v414_v57  ;;  %238 = vmatpush.bf16.msra.mxu2 %v434_v62 }
  0x22   :  { %226 = vmatpush.bf16.msra.mxu1 %v418_v58  ;;  %366 = vmatpush.bf16.msra.mxu3 %v520_v18  ;;  %v566_v18 = vld [vmem:[%s698_s3 + $0x1] ss:$0 sm:$0xff] }
  0x25   :  { %214 = vmatpush.bf16.msra.mxu0 %v402_v2  ;;  %239 = vmatpush.bf16.msra.mxu2 %v422_v5 }
  0x26   :  { %227 = vmatpush.bf16.msra.mxu1 %v406_v4  ;;  %367 = vmatpush.bf16.msra.mxu3 %v516_v21 }
  0x28   :  { %215 = vmatmul.bf16.vlgmr.msra.gmra.mxu0 %v46_v8 }
  0x29   :  { %228 = vmatmul.bf16.vlgmr.msra.gmra.mxu1 %v46_v8  ;;  %240 = vmatpush.bf16.msra.mxu2 %v410_v9 }
  0x2a   :  { %368 = vmatpush.bf16.msra.mxu3 %v512_v27 }
  0x2c   :  { %241 = vmatmul.bf16.vlgmr.msra.gmra.mxu2 %v46_v8 }
  0x2e   :  { %369 = vmatpush.bf16.msra.mxu3 %v508_v35 }
  0x32   :  { %370 = vmatpush.bf16.msra.mxu3 %v504_v38 }
  0x36   :  { %371 = vmatpush.bf16.msra.mxu3 %v500_v43 }
  0xa5   :  { %v216_v26 = vpop.f32.mrf.mxu0 }
  0xa6   :  { %v246_v28 = vadd.f32 %v216_v26, %v43_v22  ;;  %v229_v29 = vpop.f32.mrf.mxu1 }
  0xa7   :  { %v266_v30 = vadd.f32 %v229_v29, %v44_v23 }
  0xa8   :  { %v495_v31 = vmul.f32 -1.442695, %v246_v28 }
  0xa9   :  { %v496_v34 = vmul.f32 -1.442695, %v266_v30 }
  0xaa   :  { %567 = vpow2.f32 %v495_v31 }
  0xab   :  { %569 = vpow2.f32 %v496_v34 }
  0xad   :  { %v218_v41 = vpop.f32.mrf.mxu0 }
  0xae   :  { %v231_v42 = vpop.f32.mrf.mxu1 }
  0xaf   :  { %v242_v45 = vpop.f32.mrf.mxu2 }
  0xb0   :  { %v568_v44 = vpop.eup %567  ;;  %v288_v62 = vadd.f32 %v565_v55, %v242_v45 }
  0xb1   :  { %v570_v46 = vpop.eup %569  ;;  %v250_v47 = vadd.f32 1.0, %v568_v44 }
  0xb2   :  { %v270_v48 = vadd.f32 1.0, %v570_v46 }
  0xb3   :  { %571 = vrcp.f32 %v250_v47  ;;  %v262_v57 = vand.u32 2147483648, %v250_v47  ;;  %v260_v59 = vand.u32 2147483647, %v250_v47  ;;  %vm256_vm1 = vweird.f32 %v250_v47 }
  0xb4   :  { %573 = vrcp.f32 %v270_v48  ;;  %vm276_vm4 = vweird.f32 %v270_v48  ;;  %v282_v6 = vand.u32 2147483648, %v270_v48  ;;  %v280_v7 = vand.u32 2147483647, %v270_v48 }
  0xb5   :  { %v263_v63 = vor.u32 1.1754944e-38, %v262_v57  ;;  %vm261_vm3 = vcmp.eq.f32.partialorder %v260_v59, 8.507059e+37 }
  0xb6   :  { %v283_v10 = vor.u32 1.1754944e-38, %v282_v6  ;;  %vm281_vm7 = vcmp.eq.f32.partialorder %v280_v7, 8.507059e+37 }
  0xb7   :  { %v244_v49 = vpop.f32.mrf.mxu2 }
  0xb9   :  { %v572_v50 = vpop.eup %571 }
  0xba   :  { %v574_v51 = vpop.eup %573  ;;  %v252_v52 = vmul.f32 %v572_v50, %v250_v47  ;;  %vm257_vm0 = vweird.f32 %v572_v50 }
  0xbb   :  { %v272_v53 = vmul.f32 %v574_v51, %v270_v48  ;;  %vm258_vm2 = vmor %vm256_vm1, %vm257_vm0  ;;  %vm277_vm5 = vweird.f32 %v574_v51 }
  0xbc   :  { %v253_v54 = vsub.f32 1.0, %v252_v52  ;;  %vm278_vm6 = vmor %vm276_vm4, %vm277_vm5 }
  0xbd   :  { %v273_v56 = vsub.f32 1.0, %v272_v53 }
  0xbe   :  { %v254_v58 = vmul.f32 %v572_v50, %v253_v54 }
  0xbf   :  { %v274_v60 = vmul.f32 %v574_v51, %v273_v56 }
  0xc0   :  { %v255_v61 = vadd.f32 %v572_v50, %v254_v58 }
  0xc1   :  { %v275_v4 = vadd.f32 %v574_v51, %v274_v60 }
  0xc2   :  { %v259_v0 = vsel %vm258_vm2, %v572_v50, %v255_v61 }
  0xc3   :  { %v264_v2 = vsel %vm261_vm3, %v263_v63, %v259_v0  ;;  %v279_v9 = vsel %vm278_vm6, %v574_v51, %v275_v4 }
  0xc4   :  { %v289_v5 = vmul.f32 %v288_v62, %v264_v2  ;;  %v284_v11 = vsel %vm281_vm7, %v283_v10, %v279_v9 }
  0xc5   :  { %v292_v12 = vsub.f32 1.0, %v284_v11  ;;  %v294_v15 = vmul.f32 %v284_v11, %v669_v3 }
  0xc6   :  { %v290_v8 = vadd.f32 %v289_v5, %v45_v1 }
  0xc8   :  { %575 = vtanh.f32 %v290_v8 }
  0xce   :  { %v576_v13 = vpop.eup %575 }
  0xcf   :  { %v293_v14 = vmul.f32 %v576_v13, %v292_v12 }
  0xd1   :  { %v295_v16 = vadd.f32 %v294_v15, %v293_v14 }
  0xd3   :  { %296 = vst [vmem:[%s700_s5] sm:$0xff] %v295_v16  ;;  %v297_v17 = vpack.c.bf16 %v295_v16, %v295_v16 }
  0xd5   :  { %372 = vmatmul.bf16.vlgmr.msra.gmra.mxu3 %v297_v17 }
 0x158   :  { %v373_v19 = vpop.f32.mrf.mxu3 }
 0x159   :  { %v374_v20 = vadd.f32 %v566_v18, %v373_v19 }
 0x15b   :  { %377 = vst [vmem:[#allocation5] sm:$0xff] %v374_v20 }
 0x15c   :  { %388 = dma.vmem_to_hbm [thread:$0]  %s384_s12, 128, %s386_s15, [#allocation4]  }
 0x160   :  { %v375_v3 = vpop.f32.mrf.mxu3 }
 0x161   :  { %627 = dma.done.wait [#allocation4], 128  }
 0x162   :  { %628 = vsyncadd [#allocation4], 4294967168 }
 0x163   :  { %397 = vsyncpa [#allocation3], 1 }
 0x164   :  { %398 = vsyncpa [#allocation4], 1 }

</bundles_post_ra>
